<compile_context>
chip_gen: v6e
topology: v6e:2x2x1
jax: 0.10.0
libtpu: 0.0.40
codegen_flags: <defaults>
</compile_context>

<pallas_src>
import jax
import jax.numpy as jnp
import numpy as np
from jax import lax
from jax.experimental import pallas as pl
from jax.experimental.pallas import tpu as pltpu


def _pick_tile(n, pref):
    """Largest power-of-two-ish divisor of n that is <= pref (or n itself)."""
    if n <= pref:
        return n
    t = pref
    while t > 1 and n % t:
        t //= 2
    return t if (t > 1 and n % t == 0) else n


# ----------------------------------------------------------------------------
# Kernel 1: tiled linear  (y = x @ W + b)   -- used for the hoisted x @ W_ih
# ----------------------------------------------------------------------------
def _linear_kernel(x_ref, w_ref, b_ref, o_ref):
    o_ref[...] = (jnp.dot(x_ref[...], w_ref[...],
                          preferred_element_type=jnp.float32) + b_ref[...])


def linear(x2d, w_t, b, *, tm_pref=256, tp_pref=2048):
    """x2d: (N, K) bf16/f32, w_t: (K, P), b: (1, P) f32 -> (N, P) f32."""
    N, K = x2d.shape
    P = w_t.shape[1]
    TM = _pick_tile(N, tm_pref)
    TP = _pick_tile(P, tp_pref)
    return pl.pallas_call(
        _linear_kernel,
        out_shape=jax.ShapeDtypeStruct((N, P), jnp.float32),
        grid=(N // TM, P // TP),
        in_specs=[pl.BlockSpec((TM, K), lambda i, j: (i, 0)),
                  pl.BlockSpec((K, TP), lambda i, j: (0, j)),
                  pl.BlockSpec((1, TP), lambda i, j: (0, j))],
        out_specs=pl.BlockSpec((TM, TP), lambda i, j: (i, j)),
        compiler_params=pltpu.CompilerParams(
            dimension_semantics=("parallel", "parallel")),
    )(x2d, w_t, b)


# ----------------------------------------------------------------------------
# Kernel 2: LSTM recurrence over a chunk of timesteps per grid step
# ----------------------------------------------------------------------------
def _lstm_rec_kernel(gx_ref, whh_ref, out_ref, h_ref, c_ref):
    """gx_ref: (T_tile, B, 4H) precomputed x@W_ih + b; out_ref: (T_tile, B, H)."""
    @pl.when(pl.program_id(0) == 0)
    def _():
        h_ref[...] = jnp.zeros_like(h_ref)
        c_ref[...] = jnp.zeros_like(c_ref)

    t_tile = gx_ref.shape[0]
    H = h_ref.shape[-1]
    whh = whh_ref[...]                      # resident (H, 4H) weight, bf16

    def step(t, carry):
        # Only the h @ W_hh matmul sits on the serial critical path.
        gates = gx_ref[t] + jnp.dot(h_ref[...].astype(whh.dtype), whh,
                                    preferred_element_type=jnp.float32)
        i_g = jax.nn.sigmoid(gates[:, 0:H])          # f32 gate math (v5e-safe)
        f_g = jax.nn.sigmoid(gates[:, H:2 * H])
        g_g = jnp.tanh(gates[:, 2 * H:3 * H])
        o_g = jax.nn.sigmoid(gates[:, 3 * H:4 * H])
        c_new = f_g * c_ref[...] + i_g * g_g
        h_new = o_g * jnp.tanh(c_new)
        c_ref[...] = c_new
        h_ref[...] = h_new
        out_ref[t] = h_new                           # contiguous (B, H) store
        return carry

    lax.fori_loop(0, t_tile, step, 0, unroll=(t_tile <= 16))


def lstm_recurrence(gx, w_hh_t, *, t_pref=64):
    """gx: (T, Bp, 4H) f32, w_hh_t: (H, 4H) bf16 -> hidden states (T, Bp, H) f32."""
    T, Bp, G4 = gx.shape
    H = w_hh_t.shape[0]
    t_tile = _pick_tile(T, t_pref)
    return pl.pallas_call(
        _lstm_rec_kernel,
        out_shape=jax.ShapeDtypeStruct((T, Bp, H), jnp.float32),
        grid_spec=pltpu.PrefetchScalarGridSpec(
            num_scalar_prefetch=0,
            grid=(T // t_tile,),
            in_specs=[
                pl.BlockSpec((t_tile, Bp, G4), lambda s: (s, 0, 0)),
                pl.BlockSpec((H, G4), lambda s: (0, 0)),   # weight stays resident
            ],
            out_specs=pl.BlockSpec((t_tile, Bp, H), lambda s: (s, 0, 0)),
            scratch_shapes=[pltpu.VMEM((Bp, H), jnp.float32),   # h (persists)
                            pltpu.VMEM((Bp, H), jnp.float32)],  # c (persists)
        ),
        compiler_params=pltpu.CompilerParams(
            dimension_semantics=("arbitrary",)),   # sequential recurrence
    )(gx, w_hh_t)


# ----------------------------------------------------------------------------
# Kernel 3: tiled head  (y = x @ W_lin + b once per row tile; logits = y @ E^T)
# ----------------------------------------------------------------------------
def _head_kernel(x_ref, wlin_ref, blin_ref, embt_ref, o_ref, y_ref):
    @pl.when(pl.program_id(1) == 0)   # recompute intermediate once per row tile
    def _():
        y_ref[...] = (jnp.dot(x_ref[...], wlin_ref[...],
                              preferred_element_type=jnp.float32)
                      + blin_ref[...])
    o_ref[...] = jnp.dot(y_ref[...].astype(embt_ref.dtype), embt_ref[...],
                         preferred_element_type=jnp.float32)


def _head_identity_kernel(x_ref, embt_ref, o_ref):
    o_ref[...] = jnp.dot(x_ref[...], embt_ref[...],
                         preferred_element_type=jnp.float32)


def head(x2d, w_lin_t, b_lin, emb_t, *, tn_pref=256, tv_pref=2048):
    """x2d: (N, H), emb_t: (E, V) -> logits (N, V) f32."""
    N, H = x2d.shape
    V = emb_t.shape[1]
    TN = _pick_tile(N, tn_pref)
    TV = _pick_tile(V, tv_pref)
    out_shape = jax.ShapeDtypeStruct((N, V), jnp.float32)
    grid = (N // TN, V // TV)
    if w_lin_t is None:  # Identity intermediate (hidden == embedding size)
        return pl.pallas_call(
            _head_identity_kernel,
            out_shape=out_shape,
            grid=grid,
            in_specs=[pl.BlockSpec((TN, H), lambda i, j: (i, 0)),
                      pl.BlockSpec((H, TV), lambda i, j: (0, j))],
            out_specs=pl.BlockSpec((TN, TV), lambda i, j: (i, j)),
            compiler_params=pltpu.CompilerParams(
                dimension_semantics=("parallel", "parallel")),
        )(x2d, emb_t)
    E = w_lin_t.shape[1]
    return pl.pallas_call(
        _head_kernel,
        out_shape=out_shape,
        grid_spec=pltpu.PrefetchScalarGridSpec(
            num_scalar_prefetch=0,
            grid=grid,
            in_specs=[pl.BlockSpec((TN, H), lambda i, j: (i, 0)),
                      pl.BlockSpec((H, E), lambda i, j: (0, 0)),
                      pl.BlockSpec((1, E), lambda i, j: (0, 0)),
                      pl.BlockSpec((E, TV), lambda i, j: (0, j))],
            out_specs=pl.BlockSpec((TN, TV), lambda i, j: (i, j)),
            scratch_shapes=[pltpu.VMEM((TN, E), jnp.float32)]),
        compiler_params=pltpu.CompilerParams(
            dimension_semantics=("parallel", "arbitrary")),
    )(x2d, w_lin_t, b_lin, emb_t)


# ----------------------------------------------------------------------------
# Deterministic parameter construction (mirrors LMLSTM.__init__ / _init_weights)
# ----------------------------------------------------------------------------
def build_params(key, *, embedding_size, num_cell_states, num_lstm_layers,
                 vocab_size, pad_symbol):
    keys = jax.random.split(key, 3 + 4 * num_lstm_layers)
    k_iter = iter(keys)

    # nn.Embedding: normal(0,1), padding_idx row zeroed.
    emb = jax.random.normal(next(k_iter), (vocab_size, embedding_size), jnp.float32)
    emb = emb.at[pad_symbol].set(0.0)

    lstms = []
    input_size = embedding_size
    H = num_cell_states
    for _ in range(num_lstm_layers):
        # weight_ih (4H, Din): xavier_uniform_
        lim_ih = float(np.sqrt(6.0 / (input_size + 4 * H)))
        w_ih = jax.random.uniform(next(k_iter), (4 * H, input_size),
                                  jnp.float32, -lim_ih, lim_ih)
        # weight_hh (4H, H): orthogonal_ (QR of a normal matrix)
        a = np.asarray(jax.random.normal(next(k_iter), (4 * H, H), jnp.float32))
        q, r = np.linalg.qr(a)
        q = q * np.sign(np.diag(r))[None, :]
        w_hh = jnp.asarray(q, jnp.float32)
        # biases: PyTorch LSTM default uniform(-1/sqrt(H), 1/sqrt(H))
        lim_b = 1.0 / float(np.sqrt(H))
        b_ih = jax.random.uniform(next(k_iter), (4 * H,), jnp.float32, -lim_b, lim_b)
        b_hh = jax.random.uniform(next(k_iter), (4 * H,), jnp.float32, -lim_b, lim_b)
        lstms.append((w_ih.T, w_hh.T, (b_ih + b_hh).reshape(1, 4 * H)))
        input_size = H

    if input_size != embedding_size:
        lim_l = 1.0 / float(np.sqrt(input_size))
        w_lin = jax.random.uniform(next(k_iter), (embedding_size, input_size),
                                   jnp.float32, -lim_l, lim_l)
        b_lin = jax.random.uniform(next(k_iter), (embedding_size,),
                                   jnp.float32, -lim_l, lim_l)
        w_lin_t, b_lin = w_lin.T, b_lin.reshape(1, embedding_size)
    else:
        w_lin_t, b_lin = None, None

    return {"emb": emb, "lstms": lstms, "w_lin_t": w_lin_t, "b_lin": b_lin}


# ----------------------------------------------------------------------------
# Forward (Pallas) and pure-JAX reference (mirrors the same bf16 matmul casts)
# ----------------------------------------------------------------------------
def forward_pallas(params, inputs, *, matmul_dtype=jnp.bfloat16):
    emb = params["emb"]
    B, T = inputs.shape
    # Embedding gather is glue (plain JAX); activations kept time-major (T,B,.).
    x = jnp.take(emb, inputs.T, axis=0).astype(jnp.float32)        # (T, B, E)
    # Pad batch to a multiple of 8 sublanes for the recurrence.
    Bp = ((B + 7) // 8) * 8
    if Bp != B:
        x = jnp.pad(x, ((0, 0), (0, Bp - B), (0, 0)))

    for (w_ih_t, w_hh_t, b) in params["lstms"]:
        Din = x.shape[-1]
        H = w_hh_t.shape[0]
        # (1) Hoisted input projection: one (T*Bp, Din) @ (Din, 4H) matmul + bias.
        gx = linear(x.reshape(T * Bp, Din).astype(matmul_dtype),
                    w_ih_t.astype(matmul_dtype), b)                # (T*Bp, 4H) f32
        # (2) Sequential recurrence with only h @ W_hh inside the time loop.
        x = lstm_recurrence(gx.reshape(T, Bp, 4 * H),
                            w_hh_t.astype(matmul_dtype))           # (T, Bp, H) f32

    # Drop batch padding before the (N, V) head.
    h_last = x[:, :B, :].reshape(T * B, -1)
    w_lin_t = params["w_lin_t"]
    logits2 = head(h_last.astype(matmul_dtype),
                   None if w_lin_t is None else w_lin_t.astype(matmul_dtype),
                   params["b_lin"],
                   emb.T.astype(matmul_dtype))                     # (T*B, V) f32
    return jnp.transpose(logits2.reshape(T, B, -1), (1, 0, 2))     # (B, T, V)


def forward_ref(params, inputs, *, matmul_dtype=jnp.bfloat16):
    emb = params["emb"]
    x = jnp.take(emb, inputs, axis=0).astype(jnp.float32)          # (B, T, E)
    for (w_ih_t, w_hh_t, b) in params["lstms"]:
        H = w_hh_t.shape[0]
        B = x.shape[0]
        wih = w_ih_t.astype(matmul_dtype)
        whh = w_hh_t.astype(matmul_dtype)
        gx = jnp.dot(x.astype(matmul_dtype), wih,
                     preferred_element_type=jnp.float32) + b       # (B, T, 4H)

        def step(carry, g_t):
            h, c = carry
            g = g_t + jnp.dot(h.astype(matmul_dtype), whh,
                              preferred_element_type=jnp.float32)
            i = jax.nn.sigmoid(g[:, :H])
            f = jax.nn.sigmoid(g[:, H:2 * H])
            gg = jnp.tanh(g[:, 2 * H:3 * H])
            o = jax.nn.sigmoid(g[:, 3 * H:])
            c = f * c + i * gg
            h = o * jnp.tanh(c)
            return (h, c), h

        (_, _), hs = lax.scan(step,
                              (jnp.zeros((B, H), jnp.float32),
                               jnp.zeros((B, H), jnp.float32)),
                              jnp.swapaxes(gx, 0, 1))
        x = jnp.swapaxes(hs, 0, 1)
    if params["w_lin_t"] is not None:
        x = jnp.dot(x.astype(matmul_dtype), params["w_lin_t"].astype(matmul_dtype),
                    preferred_element_type=jnp.float32) + params["b_lin"]
    return jnp.dot(x.astype(matmul_dtype), emb.T.astype(matmul_dtype),
                   preferred_element_type=jnp.float32)


# ----------------------------------------------------------------------------
if __name__ == "__main__":
    # Small config: vocab=128, emb=32, hidden=64, 2 LSTM layers, B=2, T=8.
    VOCAB, EMB, HID, LAYERS = 128, 32, 64, 2
    PAD, UNK = 0, 1
    B, T = 2, 8

    root = jax.random.PRNGKey(0)
    k_param, k_in = jax.random.split(root)
    params = build_params(k_param, embedding_size=EMB, num_cell_states=HID,
                          num_lstm_layers=LAYERS, vocab_size=VOCAB,
                          pad_symbol=PAD)
    inputs = jax.random.randint(k_in, (B, T), 0, VOCAB, dtype=jnp.int32)

    logits = jax.block_until_ready(forward_pallas(params, inputs))
    assert logits.shape == (B, T, VOCAB) and logits.dtype == jnp.float32

    ref = jax.block_until_ready(forward_ref(params, inputs))
    np.testing.assert_allclose(np.asarray(logits), np.asarray(ref),
                               rtol=2e-2, atol=2e-2)

    print("KERNEL_OK")
</pallas_src>

<mosaic_0001>
module attributes {stable_mosaic.version = 11 : i64} {
  func.func @_linear_kernel(%arg0: i32, %arg1: i32, %arg2: memref<64x32xbf16, #tpu.memory_space<vmem>>, %arg3: memref<32x256xbf16, #tpu.memory_space<vmem>>, %arg4: memref<1x256xf32, #tpu.memory_space<vmem>>, %arg5: memref<64x256xf32, #tpu.memory_space<vmem>>) attributes {dimension_semantics = [#tpu.dimension_semantics<parallel>, #tpu.dimension_semantics<parallel>], iteration_bounds = array<i64: 1, 1>, scalar_prefetch = 0 : i64, scratch_operands = 0 : i64, tpu.core_type = #tpu.core_type<tc>, window_params = [{transform_indices = @transform_0, window_bounds = array<i64: 64, 32>}, {transform_indices = @transform_1, window_bounds = array<i64: 32, 256>}, {transform_indices = @transform_2, window_bounds = array<i64: 1, 256>}, {transform_indices = @transform_3, window_bounds = array<i64: 64, 256>}]} {
    %c0 = arith.constant 0 : index
    %c0_0 = arith.constant 0 : index
    %0 = vector.load %arg2[%c0, %c0_0] : memref<64x32xbf16, #tpu.memory_space<vmem>>, vector<64x32xbf16>
    %c0_1 = arith.constant 0 : index
    %c0_2 = arith.constant 0 : index
    %1 = vector.load %arg3[%c0_1, %c0_2] : memref<32x256xbf16, #tpu.memory_space<vmem>>, vector<32x256xbf16>
    %cst = arith.constant dense<0.000000e+00> : vector<64x256xf32>
    %2 = tpu.matmul %0, %1, %cst {dimension_numbers = #tpu.dot_dimension_numbers<[1], [0], [0], [1], [0, 0, 1, 1], [], []>} : vector<64x32xbf16>, vector<32x256xbf16>, vector<64x256xf32> -> vector<64x256xf32>
    %c0_3 = arith.constant 0 : index
    %c0_4 = arith.constant 0 : index
    %3 = vector.load %arg4[%c0_3, %c0_4] : memref<1x256xf32, #tpu.memory_space<vmem>>, vector<1x256xf32>
    %4 = vector.broadcast %3 : vector<1x256xf32> to vector<64x256xf32>
    %5 = arith.addf %2, %4 : vector<64x256xf32>
    %c0_5 = arith.constant 0 : index
    %c0_6 = arith.constant 0 : index
    %6 = vector.load %arg5[%c0_5, %c0_6] : memref<64x256xf32, #tpu.memory_space<vmem>>, vector<64x256xf32>
    tpu.vector_store %arg5[%c0_5, %c0_6], %5 {strides = array<i32>} : memref<64x256xf32, #tpu.memory_space<vmem>>, vector<64x256xf32>,
    return
  }
  func.func @transform_0(%arg0: i32, %arg1: i32) -> (i32, i32) {
    %c0_i32 = arith.constant 0 : i32
    %c0_i32_0 = arith.constant 0 : i32
    return %arg0, %c0_i32 : i32, i32
  }
  func.func @transform_1(%arg0: i32, %arg1: i32) -> (i32, i32) {
    %c0_i32 = arith.constant 0 : i32
    %c0_i32_0 = arith.constant 0 : i32
    return %c0_i32, %arg1 : i32, i32
  }
  func.func @transform_2(%arg0: i32, %arg1: i32) -> (i32, i32) {
    %c0_i32 = arith.constant 0 : i32
    %c0_i32_0 = arith.constant 0 : i32
    return %c0_i32, %arg1 : i32, i32
  }
  func.func @transform_3(%arg0: i32, %arg1: i32) -> (i32, i32) {
    %c0_i32 = arith.constant 0 : i32
    return %arg0, %arg1 : i32, i32
  }
}

</mosaic_0001>

<bundles_post_ra>
// kernel: tpu_custom_call.1
= control target key start
LH: loop header
LB: loop body
LE: loop exit
PB: predicated region body
PF: predicated region fallthrough
CT: control target
= control target key end

     0   :  { %v250_v2 = vmov 0   ;;  %vm80_vm0 = vcmask 261120   ;;  %s304_s0 = inlined_call_operand.vmem [shape: bf16[64,32], index: 0, kind: input, shape index: {}]   ;;  %s305_s1 = inlined_call_operand.vmem [shape: bf16[32,256], index: 1, kind: input, shape index: {}]   ;;  %s306_s2 = inlined_call_operand.vmem [shape: f32[1,256], index: 2, kind: input, shape index: {}]   ;;  %s307_s3 = inlined_call_operand.hbm [shape: f32[64,256], index: 3, kind: output, shape index: {}]  }
   0x1   :  { %v218_v0 = vld [vmem:[%s305_s1 + $0x14] ss:$8 sps:$4 sm:$0xff]   ;;  %v220_v1 = vld [vmem:[%s305_s1 + $0x10] ss:$8 sps:$4 sm:$0xff]   ;;  %125 = vmatprep.mubr.bf16.mxu0 %v250_v2  ;;  %145 = vmatprep.mubr.bf16.mxu1 %v250_v2  ;;  %v221_v3 = vld [vmem:[%s305_s1 + $0x4] ss:$8 sps:$4 sm:$0xff]  }
   0x2   :  { %105 = vmatprep.subr.bf16.mxu0 %v218_v0  ;;  %210 = vmatprep.subr.bf16.mxu1 %v218_v0  ;;  %v223_v4 = vld [vmem:[%s305_s1] ss:$8 sps:$4 sm:$0xff]   ;;  %v225_v6 = vld [vmem:[%s304_s0 + $0x10] sm:$0xff]  }
   0x3   :  { %106 = vmatpush1.bf16.msra.mxu0 %v220_v1  ;;  %212 = vmatpush1.bf16.msra.mxu1 %v220_v1  ;;  %v224_v5 = vld [vmem:[%s304_s0] sm:$0xff]  }
   0x4   :  { %107 = vmatprep.subr.bf16.mxu0 %v221_v3  ;;  %211 = vmatprep.subr.bf16.mxu1 %v221_v3 }
   0x7   :  { %108 = vmatpush1.bf16.msra.mxu0 %v223_v4  ;;  %213 = vmatpush1.bf16.msra.mxu1 %v223_v4 }
   0x8   :  { %8 = vsyncpa [#allocation3], 0  ;;  %v226_v7 = vld [vmem:[%s304_s0 + $0x8] sm:$0xff]   ;;  %v227_v8 = vld [vmem:[%s304_s0 + $0x18] sm:$0xff]   ;;  %v30_v9 = vlaneseq  ;;  %s251_s0 = smov [#allocation2]  }
   0x9   :  { %v28_v12 = vld [vmem:[%s306_s2] sm:$0x3]  ;;  %s187_s2 = sshll.u32 %s251_s0, 4  ;;  %s188_s2 = int_to_ptr.vmem [resolvable:$true] %s187_s2 }
   0xa   :  { %206 = vmatmul.mubr.msk.bf16.vlgmr.msra.gmra.mxu0 %vm80_vm0, %v224_v5  ;;  %208 = vmatmul.mubr.msk.bf16.vlgmr.msra.gmra.mxu1 %vm80_vm0, %v225_v6  ;;  %v31_v10 = vshrl.u32 %v30_v9, 7  ;;  %s228_s29 = scalar_lea.vmem %s188_s2, 2048  ;;  %p233_p1 = scmp.lt.s32.totalorder %s188_s2, %s188_s2 }
   0xb   :  { %135 = vmatprep.mubr.bf16.mxu0 %v250_v2  ;;  %155 = vmatprep.mubr.bf16.mxu1 %v250_v2  ;;  %p229_p0 = scmp.ne.s32.totalorder %s188_s2, %s228_s29  ;;  %p234_p2 = scmp.lt.s32.totalorder %s228_s29, %s228_s29 }
   0xc   :  { %v32_v11 = vsub.s32 0, %v31_v10  ;;  %v36_v13 = vsub.s32 1, %v31_v10 }
   0xd   :  { %p235_p3 = por %p234_p2, %p233_p1 }
   0xe   :  { %v33_v14 = vrot.slane %v28_v12, %v32_v11  ;;  %v37_v15 = vrot.slane %v28_v12, %v36_v13 }
   0xf   :  { %p236_p4 = pnand %p235_p3, %p229_p0 }
  0x12   :  { %207 = vmatmul.mubr.msk.bf16.gmra.mxu0 %vm80_vm0, %v226_v7  ;;  %209 = vmatmul.mubr.msk.bf16.gmra.mxu1 %vm80_vm0, %v227_v8 }
  0xca   :  { %v127_v16 = vpop.f32.mrf.mxu0  ;;  %v147_v17 = vpop.f32.mrf.mxu1 }
  0xcb   :  { %v128_v18 = vadd.f32 %v127_v16, %v33_v14  ;;  %v148_v19 = vadd.f32 %v147_v17, %v33_v14 }
  0xcc   :  { %v129_v20 = vpop.f32.mrf.mxu0  ;;  %v149_v21 = vpop.f32.mrf.mxu1 }
  0xcd   :  { %166 = vst [vmem:[#allocation2] sm:$0xff] %v128_v18  ;;  %174 = vst [vmem:[#allocation2 + $0x40] sm:$0xff] %v148_v19  ;;  %v130_v22 = vadd.f32 %v129_v20, %v37_v15  ;;  %v150_v23 = vadd.f32 %v149_v21, %v37_v15 }
  0xce   :  { %v131_v24 = vpop.f32.mrf.mxu0  ;;  %v151_v25 = vpop.f32.mrf.mxu1 }
  0xcf   :  { %167 = vst [vmem:[#allocation2 + $0x8] sm:$0xff] %v130_v22  ;;  %175 = vst [vmem:[#allocation2 + $0x48] sm:$0xff] %v150_v23  ;;  %v132_v26 = vadd.f32 %v131_v24, %v33_v14  ;;  %v152_v27 = vadd.f32 %v151_v25, %v33_v14 }
  0xd0   :  { %v133_v28 = vpop.f32.mrf.mxu0  ;;  %v153_v29 = vpop.f32.mrf.mxu1 }
  0xd1   :  { %168 = vst [vmem:[#allocation2 + $0x10] sm:$0xff] %v132_v26  ;;  %176 = vst [vmem:[#allocation2 + $0x50] sm:$0xff] %v152_v27  ;;  %v134_v30 = vadd.f32 %v133_v28, %v37_v15  ;;  %v154_v31 = vadd.f32 %v153_v29, %v37_v15 }
  0xd2   :  { %v137_v32 = vpop.f32.mrf.mxu0  ;;  %v157_v33 = vpop.f32.mrf.mxu1 }
  0xd3   :  { %169 = vst [vmem:[#allocation2 + $0x18] sm:$0xff] %v134_v30  ;;  %177 = vst [vmem:[#allocation2 + $0x58] sm:$0xff] %v154_v31  ;;  %v138_v34 = vadd.f32 %v137_v32, %v33_v14  ;;  %v158_v35 = vadd.f32 %v157_v33, %v33_v14 }
  0xd4   :  { %v139_v36 = vpop.f32.mrf.mxu0  ;;  %v159_v37 = vpop.f32.mrf.mxu1 }
  0xd5   :  { %170 = vst [vmem:[#allocation2 + $0x20] sm:$0xff] %v138_v34  ;;  %178 = vst [vmem:[#allocation2 + $0x60] sm:$0xff] %v158_v35  ;;  %v140_v38 = vadd.f32 %v139_v36, %v37_v15  ;;  %v160_v39 = vadd.f32 %v159_v37, %v37_v15 }
  0xd6   :  { %v141_v40 = vpop.f32.mrf.mxu0  ;;  %v161_v41 = vpop.f32.mrf.mxu1 }
  0xd7   :  { %171 = vst [vmem:[#allocation2 + $0x28] sm:$0xff] %v140_v38  ;;  %179 = vst [vmem:[#allocation2 + $0x68] sm:$0xff] %v160_v39  ;;  %v142_v42 = vadd.f32 %v141_v40, %v33_v14  ;;  %v162_v43 = vadd.f32 %v161_v41, %v33_v14 }
  0xd8   :  { %v143_v44 = vpop.f32.mrf.mxu0  ;;  %v163_v45 = vpop.f32.mrf.mxu1 }
  0xd9   :  { %172 = vst [vmem:[#allocation2 + $0x30] sm:$0xff] %v142_v42  ;;  %180 = vst [vmem:[#allocation2 + $0x70] sm:$0xff] %v162_v43  ;;  %v144_v46 = vadd.f32 %v143_v44, %v37_v15  ;;  %v164_v47 = vadd.f32 %v163_v45, %v37_v15 }
  0xdb   :  { %173 = vst [vmem:[#allocation2 + $0x38] sm:$0xff] %v144_v46  ;;  %181 = vst [vmem:[#allocation2 + $0x78] sm:$0xff] %v164_v47 }
  0xdc   :  { %239 = shalt.err (!%p236_p4)
}
  0xdd   :  { %s252_s30 = smov 256   ;;  %s253_s4 = smov 16  }
  0xde   :  { %193 = dma.vmem_to_hbm [thread:$0]  %s188_s2, 2048, %s307_s3, [#allocation3], %s252_s30, %s252_s30, %s253_s4  }
  0xdf   :  { %248 = dma.done.wait [#allocation3], 2048  }
  0xe0   :  { %249 = vsyncadd [#allocation3], 4294965248 }
  0xe1   :  { %197 = vsyncpa [#allocation3], 1 }

</bundles_post_ra>
